<compile_context>
chip_gen: v6e
topology: v6e:2x2x1
jax: 0.10.0
libtpu: 0.0.40
codegen_flags: <defaults>
</compile_context>

<pallas_src>
import functools

import jax
import jax.numpy as jnp
from jax.experimental import pallas as pl
from jax.experimental.pallas import tpu as pltpu


# ----------------------------- Pallas kernel -----------------------------

def _round_up(x, m):
    return (x + m - 1) // m * m


def _matmul_epilogue_kernel(x_ref, w_ref, scale_ref, shift_ref, o_ref, acc_ref,
                            *, apply_relu):
    """One (tm, tn) output tile, accumulated over the K grid axis.

    acc = sum_k x[tm, tk] @ w[tk, tn]   (bf16 operands, f32 accumulate on MXU)
    out = relu?(acc * scale + shift)    (f32 epilogue at the last K step)
    """
    @pl.when(pl.program_id(2) == 0)
    def _():
        acc_ref[...] = jnp.zeros_like(acc_ref)

    acc_ref[...] += jnp.dot(x_ref[...], w_ref[...],
                            preferred_element_type=jnp.float32)

    @pl.when(pl.program_id(2) == pl.num_programs(2) - 1)
    def _():
        y = acc_ref[...] * scale_ref[...] + shift_ref[...]
        if apply_relu:
            y = jnp.maximum(y, 0.0)
        o_ref[...] = y.astype(o_ref.dtype)


def fused_matmul(x, w, scale, shift, *, relu=False, tm=128, tn=256, tk=256):
    """(x @ w) * scale + shift (+ optional ReLU).

    x: [M, K] f32, w: [K, N] f32, scale/shift: [N] f32 -> [M, N] f32.
    Operands are cast to bf16 at the pallas_call boundary (halves DMA bytes,
    bf16-native MXU); accumulation and epilogue stay in f32.  M/K/N are padded
    so blocks are (8,128)-aligned and the kernel output is lane-dense.
    """
    M, K = x.shape
    K2, N = w.shape
    assert K == K2

    Mp = _round_up(M, 16)          # bf16 sublane packing
    Kp = _round_up(K, 128)
    Np = _round_up(N, 128)         # lane-dense output (no masked vst)
    tm = min(tm, Mp)
    tk = min(tk, Kp)
    tn = min(tn, Np)
    Mp = _round_up(Mp, tm)
    Kp = _round_up(Kp, tk)
    Np = _round_up(Np, tn)

    xp = jnp.pad(x, ((0, Mp - M), (0, Kp - K))).astype(jnp.bfloat16)
    wp = jnp.pad(w, ((0, Kp - K), (0, Np - N))).astype(jnp.bfloat16)
    sp = jnp.pad(scale.astype(jnp.float32), (0, Np - N)).reshape(1, Np)
    bp = jnp.pad(shift.astype(jnp.float32), (0, Np - N)).reshape(1, Np)

    grid = (Mp // tm, Np // tn, Kp // tk)
    out = pl.pallas_call(
        functools.partial(_matmul_epilogue_kernel, apply_relu=relu),
        out_shape=jax.ShapeDtypeStruct((Mp, Np), jnp.float32),
        grid=grid,
        in_specs=[
            pl.BlockSpec((tm, tk), lambda i, j, k: (i, k)),
            pl.BlockSpec((tk, tn), lambda i, j, k: (k, j)),
            pl.BlockSpec((1, tn), lambda i, j, k: (0, j)),
            pl.BlockSpec((1, tn), lambda i, j, k: (0, j)),
        ],
        out_specs=pl.BlockSpec((tm, tn), lambda i, j, k: (i, j)),
        scratch_shapes=[pltpu.VMEM((tm, tn), jnp.float32)],
        compiler_params=pltpu.CompilerParams(
            dimension_semantics=("parallel", "parallel", "arbitrary"),
            vmem_limit_bytes=32 * 1024 * 1024,   # well under v7x's 64 MiB
        ),
    )(xp, wp, sp, bp)
    return out[:M, :N]


# ------------------------------ model glue ------------------------------

def bn_fold(gamma, beta, mean, var, eps=1e-5):
    """Eval-mode BatchNorm folded to a per-channel scale/shift."""
    scale = gamma * jax.lax.rsqrt(var + eps)
    shift = beta - mean * scale
    return scale, shift


def init_params(key, in_channels, num_classes):
    """Synthetic weights with the exact FCNHead structure.

    # TODO(synk): the real module pulls fcn_resnet50 via torch.hub (network);
    # it is constructed with pretrained=False, so randomly-initialized weights
    # of the same shapes are used here.
    """
    inter = in_channels // 4
    ks = jax.random.split(key, 7)

    def w(k, shape, fan_in):
        return jax.random.normal(k, shape, jnp.float32) / jnp.sqrt(float(fan_in))

    return {
        "conv1_w": w(ks[0], (inter, in_channels, 3, 3), in_channels * 9),
        "bn_gamma": 1.0 + 0.1 * jax.random.normal(ks[1], (inter,), jnp.float32),
        "bn_beta": 0.1 * jax.random.normal(ks[2], (inter,), jnp.float32),
        "bn_mean": 0.1 * jax.random.normal(ks[3], (inter,), jnp.float32),
        "bn_var": 1.0 + 0.1 * jnp.abs(jax.random.normal(ks[4], (inter,), jnp.float32)),
        "conv2_w": w(ks[5], (num_classes, inter, 1, 1), inter),
        "conv2_b": 0.01 * jax.random.normal(ks[6], (num_classes,), jnp.float32),
    }


def fcn_seghead_forward(params, x):
    """x: [B, in_channels]  (the PyTorch forward unsqueezes it to [B,C,1,1])."""
    B = x.shape[0]

    # classifier[0]: Conv2d(C, C//4, 3, padding=1, bias=False) on a 1x1 spatial
    # map.  With zero padding only the (1,1) center tap ever multiplies real
    # data, so the conv is exactly x @ W[:, :, 1, 1].T  — fused with
    # classifier[1] BatchNorm (scale/shift) and classifier[2] ReLU.
    w1 = jnp.transpose(params["conv1_w"][:, :, 1, 1], (1, 0))   # [C, C//4]
    scale, shift = bn_fold(params["bn_gamma"], params["bn_beta"],
                           params["bn_mean"], params["bn_var"])
    h = fused_matmul(x, w1, scale, shift, relu=True)

    # TODO(synk): classifier[3] nn.Dropout(0.1) is identity in eval/inference
    # mode; training-mode stochastic dropout is not implemented.

    # classifier[4]: Conv2d(C//4, num_classes, 1) with bias.
    w2 = jnp.transpose(params["conv2_w"][:, :, 0, 0], (1, 0))   # [C//4, num_classes]
    ones = jnp.ones_like(params["conv2_b"])
    out = fused_matmul(h, w2, ones, params["conv2_b"], relu=False)

    # back to PyTorch output shape [B, num_classes, 1, 1]
    return out.reshape(B, -1, 1, 1)


if __name__ == "__main__":
    IN_CHANNELS = 512        # stand-in for the real classifier's 2048 inputs
    NUM_CLASSES = 21
    BATCH = 16

    key = jax.random.PRNGKey(0)
    k_p, k_x = jax.random.split(key)
    params = init_params(k_p, IN_CHANNELS, NUM_CLASSES)
    x = jax.random.normal(k_x, (BATCH, IN_CHANNELS), jnp.float32)

    out = jax.jit(fcn_seghead_forward)(params, x)
    out = jax.block_until_ready(out)
    assert out.shape == (BATCH, NUM_CLASSES, 1, 1) and out.dtype == jnp.float32
    print("KERNEL_OK")
</pallas_src>

<mosaic_0001>
module attributes {stable_mosaic.version = 11 : i64} {
  func.func @_matmul_epilogue_kernel(%arg0: i32, %arg1: i32, %arg2: i32, %arg3: memref<16x256xbf16, #tpu.memory_space<vmem>>, %arg4: memref<256x128xbf16, #tpu.memory_space<vmem>>, %arg5: memref<1x128xf32, #tpu.memory_space<vmem>>, %arg6: memref<1x128xf32, #tpu.memory_space<vmem>>, %arg7: memref<16x128xf32, #tpu.memory_space<vmem>>, %arg8: memref<16x128xf32, #tpu.memory_space<vmem>>) attributes {dimension_semantics = [#tpu.dimension_semantics<parallel>, #tpu.dimension_semantics<parallel>, #tpu.dimension_semantics<arbitrary>], iteration_bounds = array<i64: 1, 1, 2>, scalar_prefetch = 0 : i64, scratch_operands = 1 : i64, tpu.core_type = #tpu.core_type<tc>, window_params = [{transform_indices = @transform_0, window_bounds = array<i64: 16, 256>}, {transform_indices = @transform_1, window_bounds = array<i64: 256, 128>}, {transform_indices = @transform_2, window_bounds = array<i64: 1, 128>}, {transform_indices = @transform_3, window_bounds = array<i64: 1, 128>}, {transform_indices = @transform_4, window_bounds = array<i64: 16, 128>}]} {
    %c0_i32 = arith.constant 0 : i32
    %0 = arith.cmpi eq, %arg2, %c0_i32 : i32
    %1 = arith.extui %0 : i1 to i32
    %c0_i32_0 = arith.constant 0 : i32
    %2 = arith.cmpi ne, %1, %c0_i32_0 : i32
    scf.if %2 {
      %cst_9 = arith.constant 0.000000e+00 : f32
      %12 = vector.broadcast %cst_9 : f32 to vector<16x128xf32>
      %c0_10 = arith.constant 0 : index
      %c0_11 = arith.constant 0 : index
      %13 = vector.load %arg8[%c0_10, %c0_11] : memref<16x128xf32, #tpu.memory_space<vmem>>, vector<16x128xf32>
      tpu.vector_store %arg8[%c0_10, %c0_11], %12 {strides = array<i32>} : memref<16x128xf32, #tpu.memory_space<vmem>>, vector<16x128xf32>,
    } else {
    }
    %c0 = arith.constant 0 : index
    %c0_1 = arith.constant 0 : index
    %3 = vector.load %arg8[%c0, %c0_1] : memref<16x128xf32, #tpu.memory_space<vmem>>, vector<16x128xf32>
    %c0_2 = arith.constant 0 : index
    %c0_3 = arith.constant 0 : index
    %4 = vector.load %arg3[%c0_2, %c0_3] : memref<16x256xbf16, #tpu.memory_space<vmem>>, vector<16x256xbf16>
    %c0_4 = arith.constant 0 : index
    %c0_5 = arith.constant 0 : index
    %5 = vector.load %arg4[%c0_4, %c0_5] : memref<256x128xbf16, #tpu.memory_space<vmem>>, vector<256x128xbf16>
    %cst = arith.constant dense<0.000000e+00> : vector<16x128xf32>
    %6 = tpu.matmul %4, %5, %cst {dimension_numbers = #tpu.dot_dimension_numbers<[1], [0], [0], [1], [0, 0, 1, 1], [], []>} : vector<16x256xbf16>, vector<256x128xbf16>, vector<16x128xf32> -> vector<16x128xf32>
    %7 = arith.addf %3, %6 : vector<16x128xf32>
    %c0_6 = arith.constant 0 : index
    %c0_7 = arith.constant 0 : index
    %8 = vector.load %arg8[%c0_6, %c0_7] : memref<16x128xf32, #tpu.memory_space<vmem>>, vector<16x128xf32>
    tpu.vector_store %arg8[%c0_6, %c0_7], %7 {strides = array<i32>} : memref<16x128xf32, #tpu.memory_space<vmem>>, vector<16x128xf32>,
    %c1_i32 = arith.constant 1 : i32
    %9 = arith.cmpi eq, %arg2, %c1_i32 : i32
    %10 = arith.extui %9 : i1 to i32
    %c0_i32_8 = arith.constant 0 : i32
    %11 = arith.cmpi ne, %10, %c0_i32_8 : i32
    scf.if %11 {
      %c0_9 = arith.constant 0 : index
      %c0_10 = arith.constant 0 : index
      %12 = vector.load %arg8[%c0_9, %c0_10] : memref<16x128xf32, #tpu.memory_space<vmem>>, vector<16x128xf32>
      %c0_11 = arith.constant 0 : index
      %c0_12 = arith.constant 0 : index
      %13 = vector.load %arg5[%c0_11, %c0_12] : memref<1x128xf32, #tpu.memory_space<vmem>>, vector<1x128xf32>
      %14 = vector.broadcast %13 : vector<1x128xf32> to vector<16x128xf32>
      %15 = arith.mulf %12, %14 : vector<16x128xf32>
      %c0_13 = arith.constant 0 : index
      %c0_14 = arith.constant 0 : index
      %16 = vector.load %arg6[%c0_13, %c0_14] : memref<1x128xf32, #tpu.memory_space<vmem>>, vector<1x128xf32>
      %17 = vector.broadcast %16 : vector<1x128xf32> to vector<16x128xf32>
      %18 = arith.addf %15, %17 : vector<16x128xf32>
      %cst_15 = arith.constant 0.000000e+00 : f32
      %19 = vector.broadcast %cst_15 : f32 to vector<16x128xf32>
      %20 = arith.maximumf %18, %19 : vector<16x128xf32>
      %c0_16 = arith.constant 0 : index
      %c0_17 = arith.constant 0 : index
      %21 = vector.load %arg7[%c0_16, %c0_17] : memref<16x128xf32, #tpu.memory_space<vmem>>, vector<16x128xf32>
      tpu.vector_store %arg7[%c0_16, %c0_17], %20 {strides = array<i32>} : memref<16x128xf32, #tpu.memory_space<vmem>>, vector<16x128xf32>,
    } else {
    }
    return
  }
  func.func @transform_0(%arg0: i32, %arg1: i32, %arg2: i32) -> (i32, i32) {
    %c0_i32 = arith.constant 0 : i32
    return %arg0, %arg2 : i32, i32
  }
  func.func @transform_1(%arg0: i32, %arg1: i32, %arg2: i32) -> (i32, i32) {
    %c0_i32 = arith.constant 0 : i32
    return %arg2, %arg1 : i32, i32
  }
  func.func @transform_2(%arg0: i32, %arg1: i32, %arg2: i32) -> (i32, i32) {
    %c0_i32 = arith.constant 0 : i32
    %c0_i32_0 = arith.constant 0 : i32
    return %c0_i32, %arg1 : i32, i32
  }
  func.func @transform_3(%arg0: i32, %arg1: i32, %arg2: i32) -> (i32, i32) {
    %c0_i32 = arith.constant 0 : i32
    %c0_i32_0 = arith.constant 0 : i32
    return %c0_i32, %arg1 : i32, i32
  }
  func.func @transform_4(%arg0: i32, %arg1: i32, %arg2: i32) -> (i32, i32) {
    %c0_i32 = arith.constant 0 : i32
    return %arg0, %arg1 : i32, i32
  }
}

module attributes {stable_mosaic.version = 11 : i64} {
  func.func @_matmul_epilogue_kernel(%arg0: i32, %arg1: i32, %arg2: i32, %arg3: memref<16x128xbf16, #tpu.memory_space<vmem>>, %arg4: memref<128x128xbf16, #tpu.memory_space<vmem>>, %arg5: memref<1x128xf32, #tpu.memory_space<vmem>>, %arg6: memref<1x128xf32, #tpu.memory_space<vmem>>, %arg7: memref<16x128xf32, #tpu.memory_space<vmem>>, %arg8: memref<16x128xf32, #tpu.memory_space<vmem>>) attributes {dimension_semantics = [#tpu.dimension_semantics<parallel>, #tpu.dimension_semantics<parallel>, #tpu.dimension_semantics<arbitrary>], iteration_bounds = array<i64: 1, 1, 1>, scalar_prefetch = 0 : i64, scratch_operands = 1 : i64, tpu.core_type = #tpu.core_type<tc>, window_params = [{transform_indices = @transform_0, window_bounds = array<i64: 16, 128>}, {transform_indices = @transform_1, window_bounds = array<i64: 128, 128>}, {transform_indices = @transform_2, window_bounds = array<i64: 1, 128>}, {transform_indices = @transform_3, window_bounds = array<i64: 1, 128>}, {transform_indices = @transform_4, window_bounds = array<i64: 16, 128>}]} {
    %c0_i32 = arith.constant 0 : i32
    %0 = arith.cmpi eq, %arg2, %c0_i32 : i32
    %1 = arith.extui %0 : i1 to i32
    %c0_i32_0 = arith.constant 0 : i32
    %2 = arith.cmpi ne, %1, %c0_i32_0 : i32
    scf.if %2 {
      %cst_10 = arith.constant 0.000000e+00 : f32
      %12 = vector.broadcast %cst_10 : f32 to vector<16x128xf32>
      %c0_11 = arith.constant 0 : index
      %c0_12 = arith.constant 0 : index
      %13 = vector.load %arg8[%c0_11, %c0_12] : memref<16x128xf32, #tpu.memory_space<vmem>>, vector<16x128xf32>
      tpu.vector_store %arg8[%c0_11, %c0_12], %12 {strides = array<i32>} : memref<16x128xf32, #tpu.memory_space<vmem>>, vector<16x128xf32>,
    } else {
    }
    %c0 = arith.constant 0 : index
    %c0_1 = arith.constant 0 : index
    %3 = vector.load %arg8[%c0, %c0_1] : memref<16x128xf32, #tpu.memory_space<vmem>>, vector<16x128xf32>
    %c0_2 = arith.constant 0 : index
    %c0_3 = arith.constant 0 : index
    %4 = vector.load %arg3[%c0_2, %c0_3] : memref<16x128xbf16, #tpu.memory_space<vmem>>, vector<16x128xbf16>
    %c0_4 = arith.constant 0 : index
    %c0_5 = arith.constant 0 : index
    %5 = vector.load %arg4[%c0_4, %c0_5] : memref<128x128xbf16, #tpu.memory_space<vmem>>, vector<128x128xbf16>
    %cst = arith.constant dense<0.000000e+00> : vector<16x128xf32>
    %6 = tpu.matmul %4, %5, %cst {dimension_numbers = #tpu.dot_dimension_numbers<[1], [0], [0], [1], [0, 0, 1, 1], [], []>} : vector<16x128xbf16>, vector<128x128xbf16>, vector<16x128xf32> -> vector<16x128xf32>
    %7 = arith.addf %3, %6 : vector<16x128xf32>
    %c0_6 = arith.constant 0 : index
    %c0_7 = arith.constant 0 : index
    %8 = vector.load %arg8[%c0_6, %c0_7] : memref<16x128xf32, #tpu.memory_space<vmem>>, vector<16x128xf32>
    tpu.vector_store %arg8[%c0_6, %c0_7], %7 {strides = array<i32>} : memref<16x128xf32, #tpu.memory_space<vmem>>, vector<16x128xf32>,
    %c0_i32_8 = arith.constant 0 : i32
    %9 = arith.cmpi eq, %arg2, %c0_i32_8 : i32
    %10 = arith.extui %9 : i1 to i32
    %c0_i32_9 = arith.constant 0 : i32
    %11 = arith.cmpi ne, %10, %c0_i32_9 : i32
    scf.if %11 {
      %c0_10 = arith.constant 0 : index
      %c0_11 = arith.constant 0 : index
      %12 = vector.load %arg8[%c0_10, %c0_11] : memref<16x128xf32, #tpu.memory_space<vmem>>, vector<16x128xf32>
      %c0_12 = arith.constant 0 : index
      %c0_13 = arith.constant 0 : index
      %13 = vector.load %arg5[%c0_12, %c0_13] : memref<1x128xf32, #tpu.memory_space<vmem>>, vector<1x128xf32>
      %14 = vector.broadcast %13 : vector<1x128xf32> to vector<16x128xf32>
      %15 = arith.mulf %12, %14 : vector<16x128xf32>
      %c0_14 = arith.constant 0 : index
      %c0_15 = arith.constant 0 : index
      %16 = vector.load %arg6[%c0_14, %c0_15] : memref<1x128xf32, #tpu.memory_space<vmem>>, vector<1x128xf32>
      %17 = vector.broadcast %16 : vector<1x128xf32> to vector<16x128xf32>
      %18 = arith.addf %15, %17 : vector<16x128xf32>
      %c0_16 = arith.constant 0 : index
      %c0_17 = arith.constant 0 : index
      %19 = vector.load %arg7[%c0_16, %c0_17] : memref<16x128xf32, #tpu.memory_space<vmem>>, vector<16x128xf32>
      tpu.vector_store %arg7[%c0_16, %c0_17], %18 {strides = array<i32>} : memref<16x128xf32, #tpu.memory_space<vmem>>, vector<16x128xf32>,
    } else {
    }
    return
  }
  func.func @transform_0(%arg0: i32, %arg1: i32, %arg2: i32) -> (i32, i32) {
    %c0_i32 = arith.constant 0 : i32
    return %arg0, %arg2 : i32, i32
  }
  func.func @transform_1(%arg0: i32, %arg1: i32, %arg2: i32) -> (i32, i32) {
    %c0_i32 = arith.constant 0 : i32
    return %arg2, %arg1 : i32, i32
  }
  func.func @transform_2(%arg0: i32, %arg1: i32, %arg2: i32) -> (i32, i32) {
    %c0_i32 = arith.constant 0 : i32
    %c0_i32_0 = arith.constant 0 : i32
    return %c0_i32, %arg1 : i32, i32
  }
  func.func @transform_3(%arg0: i32, %arg1: i32, %arg2: i32) -> (i32, i32) {
    %c0_i32 = arith.constant 0 : i32
    %c0_i32_0 = arith.constant 0 : i32
    return %c0_i32, %arg1 : i32, i32
  }
  func.func @transform_4(%arg0: i32, %arg1: i32, %arg2: i32) -> (i32, i32) {
    %c0_i32 = arith.constant 0 : i32
    return %arg0, %arg1 : i32, i32
  }
}

</mosaic_0001>

<bundles_post_ra>
// kernel: fcn_seghead_forward.3
= control target key start
LH: loop header
LB: loop body
LE: loop exit
PB: predicated region body
PF: predicated region fallthrough
CT: control target
= control target key end

     0   :  { %v261_v1 = vmov 0.0   ;;  %vm262_vm0 = vmmov 0   ;;  %s327_s0 = inlined_call_operand.vmem [shape: bf16[16,128], index: 0, kind: input, shape index: {}]   ;;  %s328_s1 = inlined_call_operand.vmem [shape: bf16[128,128], index: 1, kind: input, shape index: {}]   ;;  %s329_s2 = inlined_call_operand.vmem [shape: f32[1,128], index: 2, kind: input, shape index: {}]   ;;  %s330_s3 = inlined_call_operand.vmem [shape: f32[1,128], index: 3, kind: input, shape index: {}]   ;;  %s331_s4 = inlined_call_operand.hbm [shape: f32[16,128], index: 4, kind: output, shape index: {}]  }
   0x1   :  { %v230_v0 = vld [vmem:[%s328_s1 + $0x38] sm:$0xff]   ;;  %205 = vmatprep.subr.bf16.mxu0 %v261_v1  ;;  %v231_v2 = vld [vmem:[%s328_s1 + $0x30] sm:$0xff]   ;;  %221 = vmatprep.mubr.msk.bf16.mxu0 %vm262_vm0, %v261_v1  ;;  %v232_v3 = vld [vmem:[%s328_s1 + $0x28] sm:$0xff]  }
   0x2   :  { %206 = vmatpush3.bf16.msra.mxu0 %v230_v0 }
   0x3   :  { %207 = vmatprep.subr.bf16.mxu0 %v261_v1 }
   0x6   :  { %208 = vmatpush3.bf16.msra.mxu0 %v231_v2 }
   0x7   :  { %209 = vmatprep.subr.bf16.mxu0 %v261_v1 }
   0x8   :  { %9 = vsyncpa [#allocation4], 0  ;;  %v233_v4 = vld [vmem:[%s328_s1 + $0x20] sm:$0xff]   ;;  %v234_v5 = vld [vmem:[%s328_s1 + $0x18] sm:$0xff]  }
   0x9   :  { %v235_v6 = vld [vmem:[%s328_s1 + $0x10] sm:$0xff]   ;;  %v236_v7 = vld [vmem:[%s328_s1 + $0x8] sm:$0xff]   ;;  %v237_v8 = vld [vmem:[%s328_s1] sm:$0xff]   ;;  %s263_s1 = smov [#allocation3]  }
   0xa   :  { %210 = vmatpush3.bf16.msra.mxu0 %v232_v3  ;;  %v238_v9 = vld [vmem:[%s327_s0] sm:$0xff]   ;;  %s174_s11 = sshll.u32 %s263_s1, 4  ;;  %s175_s11 = int_to_ptr.vmem [resolvable:$true] %s174_s11 }
   0xb   :  { %211 = vmatprep.subr.bf16.mxu0 %v261_v1  ;;  %v194_v10 = vld [vmem:[%s329_s2] ss:$0 sm:$0xff]  ;;  %s239_s0 = scalar_lea.vmem %s175_s11, 256  ;;  %p244_p1 = scmp.lt.s32.totalorder %s175_s11, %s175_s11 }
   0xc   :  { %v195_v12 = vld [vmem:[%s330_s3] ss:$0 sm:$0xff]  ;;  %p240_p0 = scmp.ne.s32.totalorder %s175_s11, %s239_s0  ;;  %p245_p2 = scmp.lt.s32.totalorder %s239_s0, %s239_s0 }
   0xe   :  { %212 = vmatpush3.bf16.msra.mxu0 %v233_v4  ;;  %p246_p3 = por %p245_p2, %p244_p1 }
   0xf   :  { %213 = vmatprep.subr.bf16.mxu0 %v261_v1 }
  0x10   :  { %p247_p4 = pnand %p246_p3, %p240_p0 }
  0x12   :  { %214 = vmatpush3.bf16.msra.mxu0 %v234_v5 }
  0x13   :  { %215 = vmatprep.subr.bf16.mxu0 %v261_v1 }
  0x16   :  { %216 = vmatpush3.bf16.msra.mxu0 %v235_v6 }
  0x17   :  { %217 = vmatprep.subr.bf16.mxu0 %v261_v1 }
  0x1a   :  { %218 = vmatpush3.bf16.msra.mxu0 %v236_v7 }
  0x1b   :  { %219 = vmatprep.subr.bf16.mxu0 %v261_v1 }
  0x1e   :  { %220 = vmatpush3.bf16.msra.mxu0 %v237_v8 }
  0x21   :  { %222 = vmatmul.mubr.bf16.vlgmr.msra.gmra.mxu0 %v238_v9 }
  0xe1   :  { %v133_v11 = vpop.f32.mrf.mxu0 }
  0xe2   :  { %v156_v13 = vmul.f32 %v194_v10, %v133_v11 }
  0xe3   :  { %v223_v14 = vpop.f32.mrf.mxu0 }
  0xe4   :  { %v165_v15 = vadd.f32 %v195_v12, %v156_v13 }
  0xe5   :  { %v136_v16 = vpop.f32.mrf.mxu0 }
  0xe6   :  { %167 = vst [vmem:[#allocation3] sm:$0xff] %v165_v15  ;;  %v157_v17 = vmul.f32 %v194_v10, %v136_v16 }
  0xe7   :  { %v224_v18 = vpop.f32.mrf.mxu0 }
  0xe8   :  { %v166_v19 = vadd.f32 %v195_v12, %v157_v17 }
  0xea   :  { %168 = vst [vmem:[#allocation3 + $0x8] sm:$0xff] %v166_v19 }
  0xeb   :  { %250 = shalt.err (!%p247_p4)
}
  0xec   :  { %s264_s2 = smov 128   ;;  %s265_s3 = smov 8  }
  0xed   :  { %180 = dma.vmem_to_hbm [thread:$0]  %s175_s11, 256, %s331_s4, [#allocation4], %s264_s2, %s264_s2, %s265_s3  }
  0xee   :  { %259 = dma.done.wait [#allocation4], 256  }
  0xef   :  { %260 = vsyncadd [#allocation4], 4294967040 }
  0xf0   :  { %184 = vsyncpa [#allocation4], 1 }

// kernel: fcn_seghead_forward.2
= control target key start
LH: loop header
LB: loop body
LE: loop exit
PB: predicated region body
PF: predicated region fallthrough
CT: control target
= control target key end

     0   :  { %s866_s15 = smov 0   ;;  %s868_s16 = smov 0   ;;  %s970_s0 = inlined_call_operand.vmem [shape: bf16[16,512], index: 0, kind: input, shape index: {}]   ;;  %s971_s1 = inlined_call_operand.vmem [shape: bf16[512,128], index: 1, kind: input, shape index: {}]   ;;  %s972_s2 = inlined_call_operand.vmem [shape: f32[1,128], index: 2, kind: input, shape index: {}]   ;;  %s973_s3 = inlined_call_operand.vmem [shape: f32[1,128], index: 3, kind: input, shape index: {}]   ;;  %s974_s4 = inlined_call_operand.vmem [shape: f32[16,128], index: 4, kind: output, shape index: {}]  }
   0x1   :  { %s870_s17 = smov 0   ;;  %s872_s18 = smov 0  }
   0x2   :  { %s874_s19 = smov 0  }
   0x3 LB: > { %s26_s20 = sadd.s32 1, %s834_s18  ;;  %p49_p1 = scmp.ne.s32.totalorder %s826_s16, %s822_s15  ;;  %s838_s19 = sphi %s874_s19, %s14_s19   ;;  %s834_s18 = sphi %s872_s18, %s978_s18   ;;  %s830_s17 = sphi %s870_s17, %s977_s17   ;;  %s826_s16 = sphi %s868_s16, %s976_s16   ;;  %s822_s15 = sphi %s866_s15, %s975_s15  }
   0x4   : > { %p27_p0 = scmp.ge.s32.totalorder %s26_s20, 2  ;;  %p50_p2 = scmp.eq.s32.totalorder %s838_s19, 0 }
   0x5   : > { %s42_s22 = sadd.s32 1, %s826_s16  ;;  %p683_p5 = scmp.ge.s32.totalorder %s838_s19, 2 }
   0x6   : > { %s980_s20 = smov (%p27_p0, %s26_s20), 0  ;;  %p51_p3 = por %p50_p2, %p49_p1 }
   0x7   : > { %s38_s21 = ssub.s32 %s834_s18, %s980_s20  ;;  %195 = sbr.rel (%p683_p5) target bundleno = 17 (0x11), region = 24 }
   0x8   : > { %p40_p4 = scmp.eq.s32.totalorder %s38_s21, 0 }
   0xa   : > { %s901_s23 = scalar_select %p40_p4, %s826_s16, %s42_s22  }
   0xc   : > { %198 = sbr.rel (!%p51_p3) target bundleno = 17 (0x11), region = 28  ;;  %s200_s24 = sand.u32 (%p51_p3), 1, %s826_s16  }
   0xd   : > { %s717_s25 = sshll.u32 (%p51_p3), %s834_s18, 3  ;;  %s684_s26 = sshll.u32 (%p51_p3), %s200_s24, 4 }
   0xe   : > { %s208_s29 = scalar_lea.vmem (%p51_p3), %s970_s0, %s717_s25  ;;  %s202_s30 = scalar_lea.vmem (%p51_p3), [#allocation3], %s684_s26 }
   0xf   : > { %v239_v0 = vld [vmem:[%s208_s29] sm:$0xff] (%p51_p3)  ;;  %v241_v1 = vld [vmem:[%s208_s29 + $0x10] sm:$0xff] (%p51_p3) }
  0x10   : > { %240 = vst [vmem:[%s202_s30] sm:$0xff] (%p51_p3), %v239_v0  ;;  %242 = vst [vmem:[%s202_s30 + $0x8] sm:$0xff] (%p51_p3), %v241_v1 }
  0x11 PF: > { %p687_p6 = scmp.ge.s32.totalorder %s838_s19, 1  ;;  %p259_p7 = scmp.lt.s32.totalorder %s838_s19, 3 }
  0x13   : > { %p260_p8 = pnand %p687_p6, %p259_p7 }
  0x14   : > { %s266_s5 = sand.u32 (!%p260_p8), 1, %s822_s15   ;;  %s689_s6 = sshll.u32 (!%p260_p8), %s830_s17, 5 }
  0x15   : > { %263 = sbr.rel (%p260_p8) target bundleno = 284 (0x11c), region = 70  ;;  %s913_s7 = sshll.u32 (!%p260_p8), %s266_s5, 4 }
  0x16   : > { %p311_p9 = scmp.lt.s32.totalorder (!%p260_p8), %s689_s6, 63  ;;  %s268_s12 = scalar_lea.vmem (!%p260_p8), [#allocation3], %s913_s7 }
  0x17   : > { %p691_p10 = scmp.ne.s32.totalorder (!%p260_p8), %s830_s17, 0 }
  0x1a   : > { %s982_s6 = smov (!%p311_p9, %s689_s6), 63  ;;  %338 = sbr.rel (%p691_p10) target bundleno = 33 (0x21), region = 78 }
  0x1b   : > { %s690_s8 = sshll.u32 %s982_s6, 2 }
  0x1c   : > { %s918_s11 = scalar_lea.vmem %s971_s1, %s690_s8 }
  0x1f   : > { %v840_v2 = vmov 0.0  }
  0x20   : > { %339 = vst [vmem:[#allocation2] sm:$0xff] %v840_v2  ;;  %340 = vst [vmem:[#allocation2 + $0x8] sm:$0xff] %v840_v2 }
  0x21 PF: > { %v781_v3 = vld [vmem:[%s918_s11 + $0x78] sm:$0xff]   ;;  %v783_v5 = vld [vmem:[%s918_s11 + $0x70] sm:$0xff]   ;;  %v785_v7 = vld [vmem:[%s918_s11 + $0x68] sm:$0xff]   ;;  %p710_p11 = scmp.ne.s32.totalorder %s830_s17, 1 }
  0x22   : > { %v782_v4 = vld [vmem:[%s918_s11 + $0x38] sm:$0xff]   ;;  %718 = vmatprep.subr.bf16.mxu0 %v781_v3  ;;  %v784_v6 = vld [vmem:[%s918_s11 + $0x30] sm:$0xff]   ;;  %v786_v8 = vld [vmem:[%s918_s11 + $0x28] sm:$0xff]  }
  0x23   : > { %719 = vmatpush3.bf16.msra.mxu0 %v782_v4  ;;  %v787_v9 = vld [vmem:[%s918_s11 + $0x60] sm:$0xff]   ;;  %v789_v11 = vld [vmem:[%s918_s11 + $0x58] sm:$0xff]   ;;  %v791_v13 = vld [vmem:[%s918_s11 + $0x50] sm:$0xff]  }
  0x24   : > { %720 = vmatprep.subr.bf16.mxu0 %v783_v5  ;;  %v788_v10 = vld [vmem:[%s918_s11 + $0x20] sm:$0xff]   ;;  %v790_v12 = vld [vmem:[%s918_s11 + $0x18] sm:$0xff]   ;;  %v792_v15 = vld [vmem:[%s918_s11 + $0x10] sm:$0xff]  }
  0x25   : > { %v799_v14 = vld [vmem:[%s268_s12 + $0x4] ss:$8 sps:$4 sm:$0xff]   ;;  %v797_v20 = vld [vmem:[%s268_s12] ss:$8 sps:$4 sm:$0xff]  }
  0x26   : > { %515 = vmatprep.mubr.bf16.mxu0 %v799_v14  ;;  %v793_v16 = vld [vmem:[%s918_s11 + $0x48] sm:$0xff]   ;;  %v795_v18 = vld [vmem:[%s918_s11 + $0x40] sm:$0xff]  }
  0x27   : > { %721 = vmatpush3.bf16.msra.mxu0 %v784_v6  ;;  %v794_v17 = vld [vmem:[%s918_s11 + $0x8] sm:$0xff]   ;;  %v796_v19 = vld [vmem:[%s918_s11] sm:$0xff]  }
  0x28   : > { %722 = vmatprep.subr.bf16.mxu0 %v785_v7  ;;  %v341_v22 = vld [vmem:[#allocation2] sm:$0xff]  ;;  %v342_v27 = vld [vmem:[#allocation2 + $0x8] sm:$0xff] }
  0x2b   : > { %723 = vmatpush3.bf16.msra.mxu0 %v786_v8 }
  0x2c   : > { %724 = vmatprep.subr.bf16.mxu0 %v787_v9 }
  0x2f   : > { %725 = vmatpush3.bf16.msra.mxu0 %v788_v10 }
  0x30   : > { %726 = vmatprep.subr.bf16.mxu0 %v789_v11 }
  0x33   : > { %727 = vmatpush3.bf16.msra.mxu0 %v790_v12 }
  0x34   : > { %728 = vmatprep.subr.bf16.mxu0 %v791_v13 }
  0x37   : > { %729 = vmatpush3.bf16.msra.mxu0 %v792_v15 }
  0x38   : > { %730 = vmatprep.subr.bf16.mxu0 %v793_v16 }
  0x3b   : > { %731 = vmatpush3.bf16.msra.mxu0 %v794_v17 }
  0x3c   : > { %732 = vmatprep.subr.bf16.mxu0 %v795_v18 }
  0x3f   : > { %733 = vmatpush3.bf16.msra.mxu0 %v796_v19 }
  0x42   : > { %516 = vmatmul.mubr.bf16.vlgmr.msra.gmra.mxu0 %v797_v20 }
 0x102   : > { %v734_v21 = vpop.f32.mrf.mxu0 }
 0x104   : > { %v735_v23 = vpop.f32.mrf.mxu0 }
 0x105   : > { %v736_v24 = vadd.f32 %v735_v23, %v734_v21 }
 0x106   : > { %v737_v25 = vpop.f32.mrf.mxu0 }
 0x107   : > { %v524_v26 = vadd.f32 %v736_v24, %v341_v22 }
 0x108   : > { %v738_v28 = vpop.f32.mrf.mxu0 }
 0x109   : > { %526 = vst [vmem:[#allocation2] sm:$0xff] %v524_v26  ;;  %v739_v29 = vadd.f32 %v738_v28, %v737_v25  ;;  %531 = sbr.rel (%p710_p11) target bundleno = 284 (0x11c), region = 82 }
 0x10b   : > { %v525_v30 = vadd.f32 %v739_v29, %v342_v27 }
 0x10d   : > { %527 = vst [vmem:[#allocation2 + $0x8] sm:$0xff] %v525_v30 }
 0x10e   : > { %v711_v32 = vld [vmem:[%s972_s2] ss:$0 sm:$0xff] }
 0x10f   : > { %v712_v33 = vld [vmem:[%s973_s3] ss:$0 sm:$0xff] }
 0x110   : > { %v532_v31 = vld [vmem:[#allocation2] sm:$0xff] }
 0x111   : > { %v541_v34 = vmul.f32 %v711_v32, %v532_v31 }
 0x113   : > { %v550_v37 = vadd.f32 %v712_v33, %v541_v34 }
 0x114   : > { %v533_v35 = vld [vmem:[#allocation2 + $0x8] sm:$0xff] }
 0x115   : > { %v542_v36 = vmul.f32 %v711_v32, %v533_v35  ;;  %v552_v39 = vmax.f32 %v550_v37, 0.0 }
 0x117   : > { %v551_v38 = vadd.f32 %v712_v33, %v542_v36  ;;  %554 = vst [vmem:[%s974_s4] sm:$0xff] %v552_v39 }
 0x119   : > { %v553_v40 = vmax.f32 %v551_v38, 0.0 }
 0x11b   : > { %555 = vst [vmem:[%s974_s4 + $0x8] sm:$0xff] %v553_v40 }
 0x11c PF: > { %s14_s19 = sadd.s32 1, %s838_s19   ;;  %s975_s15 = smov %s826_s16 }
 0x11d   : > { %p11_p12 = scmp.ge.s32.totalorder %s14_s19, 4   ;;  %s976_s16 = smov %s901_s23 }
 0x11e   : > { %s977_s17 = smov %s834_s18  ;;  %s978_s18 = smov %s980_s20 }
 0x11f   :  { %13 = sbr.rel (!%p11_p12) target bundleno = 3 (0x3), region = 126 }

</bundles_post_ra>
